<compile_context>
chip_gen: v7x
topology: tpu7x:2x2x1
jax: 0.10.0
libtpu: 0.0.40
codegen_flags: <defaults>
</compile_context>

<pallas_src>
import functools

import jax
import jax.numpy as jnp
from jax.experimental import pallas as pl
from jax.experimental.pallas import tpu as pltpu

EPS = 1e-5  # PyTorch BatchNorm1d default eps


def _round_up(n, m):
    return -(-n // m) * m


# ----------------------------------------------------------------------------- kernel ---

def ffnn_kernel(xcat_ref, xcont_ref, w1cat_ref, w1cont_ref, b1_ref,
                w2_ref, b2_ref, w3_ref, b3_ref, out_ref, *, offsets):
    """onehot(x_cat) @ W1cat + x_cont @ W1cont + b1 -> ReLU -> dot -> ReLU -> dot.

    Embedding tables, eval-mode BatchNorm layers and Linear biases are pre-folded into
    (W, b) at trace time, so the body is 4 small MXU dots plus cheap VPU one-hot work.
    """
    tb = xcat_ref.shape[0]
    n_oh = w1cat_ref.shape[0]

    xc = xcat_ref[...]                                                # (tb, n_cat) int32
    lanes = jax.lax.broadcasted_iota(jnp.int32, (tb, n_oh), 1)
    hit = lanes == (xc[:, 0:1] + offsets[0])
    for i in range(1, len(offsets)):
        hit = jnp.logical_or(hit, lanes == (xc[:, i:i + 1] + offsets[i]))
    onehot = jnp.where(hit, 1.0, 0.0).astype(w1cat_ref.dtype)         # (tb, n_oh)

    h = jnp.dot(onehot, w1cat_ref[...], preferred_element_type=jnp.float32)
    h = h + jnp.dot(xcont_ref[...].astype(w1cont_ref.dtype), w1cont_ref[...],
                    preferred_element_type=jnp.float32)
    h = jnp.maximum(h + b1_ref[...], 0.0)
    h = jnp.dot(h.astype(w2_ref.dtype), w2_ref[...],
                preferred_element_type=jnp.float32) + b2_ref[...]
    h = jnp.maximum(h, 0.0)
    out_ref[...] = jnp.dot(h.astype(w3_ref.dtype), w3_ref[...],
                           preferred_element_type=jnp.float32) + b3_ref[...]


# ---------------------------------------------------------------------------- folding ---

def _bn_scale_shift(g, b, m, v):
    s = g * jax.lax.rsqrt(v + EPS)
    return s, b - m * s


def fold_params(params, compute_dtype):
    """Fold eval-mode BN, Linear biases and the embedding tables into the Linear weights."""
    sc, tc = _bn_scale_shift(params["bnc_g"], params["bnc_b"], params["bnc_m"], params["bnc_v"])
    s1, t1 = _bn_scale_shift(params["bn1_g"], params["bn1_b"], params["bn1_m"], params["bn1_v"])
    s2, t2 = _bn_scale_shift(params["bn2_g"], params["bn2_b"], params["bn2_m"], params["bn2_v"])

    # Embedding tables folded into W1 (one-hot formulation): rows of W1cat for embedding i
    # are T_i @ W1e_block_i, so onehot(x_cat_i) @ W1cat == T_i[x_cat_i] @ W1e_block_i.
    # TODO(synk): only viable for tiny vocabularies (10/7/5 here); for large tables keep
    #             the gather outside the kernel or use scalar-prefetch + DMA gather.
    blocks, offsets = [], []
    off = row = 0
    for tbl in params["emb_tables"]:
        card, dim = tbl.shape
        blocks.append(tbl @ params["w1e"][row:row + dim, :])
        offsets.append(off)
        off += card
        row += dim
    w1cat = jnp.concatenate(blocks, axis=0)                 # (sum(card_i), h1)

    # bn_cont folds into the continuous block of W1 and into b1; bn1 -> W2/b2; bn2 -> W3/b3.
    w1cont = params["w1c"] * sc.reshape(-1, 1)
    b1 = params["b1"] + tc @ params["w1c"]
    w2 = params["w2"] * s1.reshape(-1, 1)
    b2 = params["b2"] + t1 @ params["w2"]
    w3 = params["w3"] * s2.reshape(-1, 1)
    b3 = params["b3"] + t2 @ params["w3"]

    return dict(
        w1cat=w1cat.astype(compute_dtype), w1cont=w1cont.astype(compute_dtype),
        b1=b1.astype(jnp.float32),
        w2=w2.astype(compute_dtype), b2=b2.astype(jnp.float32),
        w3=w3.astype(compute_dtype), b3=b3.astype(jnp.float32),
        offsets=tuple(offsets),
    )


# ---------------------------------------------------------------------------- wrapper ---

def _default_compute_dtype():
    # bf16 MXU inputs (with f32 accumulation) halve the x_cont/weight bytes on v6e/v7x;
    # keep f32 on v5e and older (no native bf16 VPU, bandwidth saving is marginal).
    try:
        kind = jax.devices()[0].device_kind.lower()
    except Exception:
        return jnp.float32
    if "v6" in kind or "v7" in kind or "7x" in kind:
        return jnp.bfloat16
    return jnp.float32


def feedforward_nn_forward(x_cat, x_cont, params, *,
                           compute_dtype=None, block_rows=2048):
    if compute_dtype is None:
        compute_dtype = _default_compute_dtype()
    fp = fold_params(params, compute_dtype)

    x_cat = x_cat.astype(jnp.int32)
    x_cont = x_cont.astype(jnp.float32)

    B, n_cat = x_cat.shape
    n_cont = x_cont.shape[1]
    n_oh, h1 = fp["w1cat"].shape
    h2 = fp["w2"].shape[1]
    out_sz = fp["w3"].shape[1]

    # Batch tiling: tb is a multiple of 8 (sublane), large enough to amortize the ~0.35 us
    # per-grid-step overhead, but clamped so the grid keeps >=2 steps when the batch allows
    # (lets v7x shard the "parallel" axis across its two TensorCores).
    b8 = _round_up(B, 8)
    tb = min(block_rows, max(8, _round_up(-(-b8 // 2), 8)))
    b_pad = _round_up(B, tb)
    if b_pad != B:
        x_cat = jnp.pad(x_cat, ((0, b_pad - B), (0, 0)))
        x_cont = jnp.pad(x_cont, ((0, b_pad - B), (0, 0)))
    grid = (b_pad // tb,)

    # --- VMEM accounting with lane-padded widths (what the tiles actually occupy) -------
    lane = lambda n: _round_up(n, 128)
    cd = jnp.dtype(compute_dtype).itemsize
    io_row = 2 * (lane(n_cat) * 4 + lane(n_cont) * 4 + lane(out_sz) * 4)   # double-buffered
    tmp_row = lane(n_oh) * cd + lane(h1) * 4 + lane(h2) * 4                # in-flight temps
    w_vmem = sum(
        _round_up(a.shape[0], 8) * lane(a.shape[1]) * a.dtype.itemsize
        for a in (fp["w1cat"], fp["w1cont"], fp["b1"], fp["w2"], fp["b2"], fp["w3"], fp["b3"]))
    vmem_bytes = int(min(48 << 20,
                         max(16 << 20, tb * (io_row + tmp_row) + 2 * w_vmem + (2 << 20))))

    w_hbm = sum(a.size * a.dtype.itemsize
                for a in (fp["w1cat"], fp["w1cont"], fp["b1"],
                          fp["w2"], fp["b2"], fp["w3"], fp["b3"]))
    cost = pl.CostEstimate(
        flops=2 * b_pad * (n_oh * h1 + n_cont * h1 + h1 * h2 + h2 * out_sz),
        transcendentals=0,
        bytes_accessed=b_pad * (n_cat * 4 + n_cont * 4 + out_sz * 4) + w_hbm,
    )

    batched = lambda i: (i, 0)    # activations / output: one batch tile per grid step
    resident = lambda i: (0, 0)   # weights / biases: same block every step (stay in VMEM)

    out = pl.pallas_call(
        functools.partial(ffnn_kernel, offsets=fp["offsets"]),
        out_shape=jax.ShapeDtypeStruct((b_pad, out_sz), jnp.float32),
        grid=grid,
        in_specs=[
            pl.BlockSpec((tb, n_cat), batched),
            pl.BlockSpec((tb, n_cont), batched),
            pl.BlockSpec(fp["w1cat"].shape, resident),
            pl.BlockSpec(fp["w1cont"].shape, resident),
            pl.BlockSpec(fp["b1"].shape, resident),
            pl.BlockSpec(fp["w2"].shape, resident),
            pl.BlockSpec(fp["b2"].shape, resident),
            pl.BlockSpec(fp["w3"].shape, resident),
            pl.BlockSpec(fp["b3"].shape, resident),
        ],
        out_specs=pl.BlockSpec((tb, out_sz), batched),
        compiler_params=pltpu.CompilerParams(
            dimension_semantics=("parallel",),
            vmem_limit_bytes=vmem_bytes,
        ),
        cost_estimate=cost,
    )(x_cat, x_cont, fp["w1cat"], fp["w1cont"], fp["b1"],
      fp["w2"], fp["b2"], fp["w3"], fp["b3"])

    return out[:B] if b_pad != B else out


# -------------------------------------------------------------------------- reference ---

def _bn_eval(x, gamma, beta, mean, var):
    return (x - mean) * jax.lax.rsqrt(var + EPS) * gamma + beta


def _reference_forward(x_cat, x_cont, params):
    """Pure-JAX reference of the PyTorch eval-mode forward, for verification."""
    embs = [tbl[x_cat[:, i]] for i, tbl in enumerate(params["emb_tables"])]
    x = jnp.concatenate(embs, axis=1)
    xc = _bn_eval(x_cont, params["bnc_g"], params["bnc_b"], params["bnc_m"], params["bnc_v"])
    x = jnp.concatenate([x, xc], axis=1)
    w1 = jnp.concatenate([params["w1e"], params["w1c"]], axis=0)
    h = jnp.maximum(x @ w1 + params["b1"], 0.0)
    h = _bn_eval(h, params["bn1_g"], params["bn1_b"], params["bn1_m"], params["bn1_v"])
    h = jnp.maximum(h @ params["w2"] + params["b2"], 0.0)
    h = _bn_eval(h, params["bn2_g"], params["bn2_b"], params["bn2_m"], params["bn2_v"])
    return h @ params["w3"] + params["b3"]


# TODO(synk): training-mode dropout (stochastic masking) and batch-statistics BatchNorm are
#             not implemented; eval-mode forward is reproduced exactly.

if __name__ == "__main__":
    key = jax.random.PRNGKey(0)

    # Small shapes consistent with the module's __init__.
    B = 8
    embedding_dim = [(10, 4), (7, 3), (5, 2)]   # (num_embeddings, embedding_dim)
    n_cont = 4
    layers = [32, 16]
    out_sz = 2
    n_emb = sum(o for _, o in embedding_dim)    # 9
    n_in = n_emb + n_cont                       # 13

    keys = jax.random.split(key, 16)
    ki = iter(keys)

    emb_tables = [
        jax.random.normal(next(ki), (card, dim), dtype=jnp.float32)
        for card, dim in embedding_dim
    ]

    def _lin(k, fan_in, fan_out):
        bound = 1.0 / jnp.sqrt(fan_in)
        kw, kb = jax.random.split(k)
        w = jax.random.uniform(kw, (fan_in, fan_out), jnp.float32, -bound, bound)
        b = jax.random.uniform(kb, (1, fan_out), jnp.float32, -bound, bound)
        return w, b

    w1, b1 = _lin(next(ki), n_in, layers[0])
    w2, b2 = _lin(next(ki), layers[0], layers[1])
    w3, b3 = _lin(next(ki), layers[1], out_sz)

    def _bn_params(n, k):
        # Non-trivial BN stats so the folding is actually exercised.
        k1, k2, k3, k4 = jax.random.split(k, 4)
        g = 1.0 + 0.1 * jax.random.normal(k1, (1, n), jnp.float32)
        b = 0.1 * jax.random.normal(k2, (1, n), jnp.float32)
        m = 0.1 * jax.random.normal(k3, (1, n), jnp.float32)
        v = 1.0 + 0.1 * jax.random.uniform(k4, (1, n), jnp.float32)
        return g, b, m, v

    bnc_g, bnc_b, bnc_m, bnc_v = _bn_params(n_cont, next(ki))
    bn1_g, bn1_b, bn1_m, bn1_v = _bn_params(layers[0], next(ki))
    bn2_g, bn2_b, bn2_m, bn2_v = _bn_params(layers[1], next(ki))

    params = dict(
        emb_tables=emb_tables,
        bnc_g=bnc_g, bnc_b=bnc_b, bnc_m=bnc_m, bnc_v=bnc_v,
        w1e=w1[:n_emb, :], w1c=w1[n_emb:, :], b1=b1,
        bn1_g=bn1_g, bn1_b=bn1_b, bn1_m=bn1_m, bn1_v=bn1_v,
        w2=w2, b2=b2,
        bn2_g=bn2_g, bn2_b=bn2_b, bn2_m=bn2_m, bn2_v=bn2_v,
        w3=w3, b3=b3,
    )

    def _make_inputs(kcat, kcont, batch):
        xc = jnp.stack(
            [jax.random.randint(jax.random.fold_in(kcat, i), (batch,), 0, card)
             for i, (card, _) in enumerate(embedding_dim)],
            axis=1,
        ).astype(jnp.int32)
        xn = jax.random.normal(kcont, (batch, n_cont), dtype=jnp.float32)
        return xc, xn

    kcat, kcont = jax.random.split(next(ki))
    x_cat, x_cont = _make_inputs(kcat, kcont, B)
    ref = _reference_forward(x_cat, x_cont, params)

    # f32 compute path: tight correctness check (single-tile grid).
    fwd_f32 = jax.jit(functools.partial(feedforward_nn_forward, compute_dtype=jnp.float32))
    out = jax.block_until_ready(fwd_f32(x_cat, x_cont, params))
    assert out.shape == (B, out_sz), out.shape
    assert jnp.allclose(out, ref, atol=1e-4, rtol=1e-4), (out, ref)

    # Larger, non-multiple-of-8 batch: exercises row padding + multi-step "parallel" grid.
    B2 = 300
    kcat2, kcont2 = jax.random.split(jax.random.fold_in(key, 7))
    x_cat2, x_cont2 = _make_inputs(kcat2, kcont2, B2)
    ref2 = _reference_forward(x_cat2, x_cont2, params)
    out2 = jax.block_until_ready(fwd_f32(x_cat2, x_cont2, params))
    assert out2.shape == (B2, out_sz), out2.shape
    assert jnp.allclose(out2, ref2, atol=1e-4, rtol=1e-4)

    # bf16 compute path (v6e/v7x bandwidth optimization): looser smoke check.
    fwd_bf16 = jax.jit(functools.partial(feedforward_nn_forward, compute_dtype=jnp.bfloat16))
    out_bf16 = jax.block_until_ready(fwd_bf16(x_cat, x_cont, params))
    assert out_bf16.shape == (B, out_sz), out_bf16.shape
    assert jnp.allclose(out_bf16, ref, atol=1e-1, rtol=1e-1), (out_bf16, ref)

    print("KERNEL_OK")
</pallas_src>

<mosaic_0001>
module attributes {stable_mosaic.version = 11 : i64} {
  func.func @ffnn_kernel(%arg0: i32, %arg1: memref<8x3xi32, #tpu.memory_space<vmem>>, %arg2: memref<8x4xf32, #tpu.memory_space<vmem>>, %arg3: memref<22x32xf32, #tpu.memory_space<vmem>>, %arg4: memref<4x32xf32, #tpu.memory_space<vmem>>, %arg5: memref<1x32xf32, #tpu.memory_space<vmem>>, %arg6: memref<32x16xf32, #tpu.memory_space<vmem>>, %arg7: memref<1x16xf32, #tpu.memory_space<vmem>>, %arg8: memref<16x2xf32, #tpu.memory_space<vmem>>, %arg9: memref<1x2xf32, #tpu.memory_space<vmem>>, %arg10: memref<8x2xf32, #tpu.memory_space<vmem>>) attributes {dimension_semantics = [#tpu.dimension_semantics<parallel>], iteration_bounds = array<i64: 1>, scalar_prefetch = 0 : i64, scratch_operands = 0 : i64, tpu.core_type = #tpu.core_type<tc>, window_params = [{transform_indices = @transform_0, window_bounds = array<i64: 8, 3>}, {transform_indices = @transform_1, window_bounds = array<i64: 8, 4>}, {pipeline_mode = #tpu.pipeline_mode<synchronous>, transform_indices = @transform_2, window_bounds = array<i64: 22, 32>}, {pipeline_mode = #tpu.pipeline_mode<synchronous>, transform_indices = @transform_3, window_bounds = array<i64: 4, 32>}, {pipeline_mode = #tpu.pipeline_mode<synchronous>, transform_indices = @transform_4, window_bounds = array<i64: 1, 32>}, {pipeline_mode = #tpu.pipeline_mode<synchronous>, transform_indices = @transform_5, window_bounds = array<i64: 32, 16>}, {pipeline_mode = #tpu.pipeline_mode<synchronous>, transform_indices = @transform_6, window_bounds = array<i64: 1, 16>}, {pipeline_mode = #tpu.pipeline_mode<synchronous>, transform_indices = @transform_7, window_bounds = array<i64: 16, 2>}, {pipeline_mode = #tpu.pipeline_mode<synchronous>, transform_indices = @transform_8, window_bounds = array<i64: 1, 2>}, {transform_indices = @transform_9, window_bounds = array<i64: 8, 2>}]} {
    %c0 = arith.constant 0 : index
    %c0_0 = arith.constant 0 : index
    %0 = vector.load %arg1[%c0, %c0_0] : memref<8x3xi32, #tpu.memory_space<vmem>>, vector<8x3xi32>
    %1 = tpu.iota {dimensions = array<i32: 1>} : vector<8x22xi32>
    %2 = vector.extract_strided_slice %0 {offsets = [0, 0], sizes = [8, 1], strides = [1, 1]} : vector<8x3xi32> to vector<8x1xi32>
    %c0_i32 = arith.constant 0 : i32
    %3 = vector.broadcast %c0_i32 : i32 to vector<8x1xi32>
    %4 = arith.addi %2, %3 : vector<8x1xi32>
    %5 = vector.broadcast %4 : vector<8x1xi32> to vector<8x22xi32>
    %6 = arith.cmpi eq, %1, %5 : vector<8x22xi32>
    %7 = vector.extract_strided_slice %0 {offsets = [0, 1], sizes = [8, 1], strides = [1, 1]} : vector<8x3xi32> to vector<8x1xi32>
    %c10_i32 = arith.constant 10 : i32
    %8 = vector.broadcast %c10_i32 : i32 to vector<8x1xi32>
    %9 = arith.addi %7, %8 : vector<8x1xi32>
    %10 = vector.broadcast %9 : vector<8x1xi32> to vector<8x22xi32>
    %11 = arith.cmpi eq, %1, %10 : vector<8x22xi32>
    %12 = arith.ori %6, %11 : vector<8x22xi1>
    %13 = vector.extract_strided_slice %0 {offsets = [0, 2], sizes = [8, 1], strides = [1, 1]} : vector<8x3xi32> to vector<8x1xi32>
    %c17_i32 = arith.constant 17 : i32
    %14 = vector.broadcast %c17_i32 : i32 to vector<8x1xi32>
    %15 = arith.addi %13, %14 : vector<8x1xi32>
    %16 = vector.broadcast %15 : vector<8x1xi32> to vector<8x22xi32>
    %17 = arith.cmpi eq, %1, %16 : vector<8x22xi32>
    %18 = arith.ori %12, %17 : vector<8x22xi1>
    %cst = arith.constant 1.000000e+00 : f32
    %cst_1 = arith.constant 0.000000e+00 : f32
    %19 = vector.broadcast %cst : f32 to vector<8x22xf32>
    %20 = vector.broadcast %cst_1 : f32 to vector<8x22xf32>
    %21 = arith.select %18, %19, %20 : vector<8x22xi1>, vector<8x22xf32>
    %c0_2 = arith.constant 0 : index
    %c0_3 = arith.constant 0 : index
    %22 = vector.load %arg3[%c0_2, %c0_3] : memref<22x32xf32, #tpu.memory_space<vmem>>, vector<22x32xf32>
    %cst_4 = arith.constant dense<0.000000e+00> : vector<8x32xf32>
    %23 = tpu.matmul %21, %22, %cst_4 {dimension_numbers = #tpu.dot_dimension_numbers<[1], [0], [0], [1], [0, 0, 1, 1], [], []>} : vector<8x22xf32>, vector<22x32xf32>, vector<8x32xf32> -> vector<8x32xf32>
    %c0_5 = arith.constant 0 : index
    %c0_6 = arith.constant 0 : index
    %24 = vector.load %arg2[%c0_5, %c0_6] : memref<8x4xf32, #tpu.memory_space<vmem>>, vector<8x4xf32>
    %c0_7 = arith.constant 0 : index
    %c0_8 = arith.constant 0 : index
    %25 = vector.load %arg4[%c0_7, %c0_8] : memref<4x32xf32, #tpu.memory_space<vmem>>, vector<4x32xf32>
    %cst_9 = arith.constant dense<0.000000e+00> : vector<8x32xf32>
    %26 = tpu.matmul %24, %25, %cst_9 {dimension_numbers = #tpu.dot_dimension_numbers<[1], [0], [0], [1], [0, 0, 1, 1], [], []>} : vector<8x4xf32>, vector<4x32xf32>, vector<8x32xf32> -> vector<8x32xf32>
    %27 = arith.addf %23, %26 : vector<8x32xf32>
    %c0_10 = arith.constant 0 : index
    %c0_11 = arith.constant 0 : index
    %28 = vector.load %arg5[%c0_10, %c0_11] : memref<1x32xf32, #tpu.memory_space<vmem>>, vector<1x32xf32>
    %29 = vector.broadcast %28 : vector<1x32xf32> to vector<8x32xf32>
    %30 = arith.addf %27, %29 : vector<8x32xf32>
    %cst_12 = arith.constant 0.000000e+00 : f32
    %31 = vector.broadcast %cst_12 : f32 to vector<8x32xf32>
    %32 = arith.maximumf %30, %31 : vector<8x32xf32>
    %c0_13 = arith.constant 0 : index
    %c0_14 = arith.constant 0 : index
    %33 = vector.load %arg6[%c0_13, %c0_14] : memref<32x16xf32, #tpu.memory_space<vmem>>, vector<32x16xf32>
    %cst_15 = arith.constant dense<0.000000e+00> : vector<8x16xf32>
    %34 = tpu.matmul %32, %33, %cst_15 {dimension_numbers = #tpu.dot_dimension_numbers<[1], [0], [0], [1], [0, 0, 1, 1], [], []>} : vector<8x32xf32>, vector<32x16xf32>, vector<8x16xf32> -> vector<8x16xf32>
    %c0_16 = arith.constant 0 : index
    %c0_17 = arith.constant 0 : index
    %35 = vector.load %arg7[%c0_16, %c0_17] : memref<1x16xf32, #tpu.memory_space<vmem>>, vector<1x16xf32>
    %36 = vector.broadcast %35 : vector<1x16xf32> to vector<8x16xf32>
    %37 = arith.addf %34, %36 : vector<8x16xf32>
    %cst_18 = arith.constant 0.000000e+00 : f32
    %38 = vector.broadcast %cst_18 : f32 to vector<8x16xf32>
    %39 = arith.maximumf %37, %38 : vector<8x16xf32>
    %c0_19 = arith.constant 0 : index
    %c0_20 = arith.constant 0 : index
    %40 = vector.load %arg8[%c0_19, %c0_20] : memref<16x2xf32, #tpu.memory_space<vmem>>, vector<16x2xf32>
    %cst_21 = arith.constant dense<0.000000e+00> : vector<8x2xf32>
    %41 = tpu.matmul %39, %40, %cst_21 {dimension_numbers = #tpu.dot_dimension_numbers<[1], [0], [0], [1], [0, 0, 1, 1], [], []>} : vector<8x16xf32>, vector<16x2xf32>, vector<8x2xf32> -> vector<8x2xf32>
    %c0_22 = arith.constant 0 : index
    %c0_23 = arith.constant 0 : index
    %42 = vector.load %arg9[%c0_22, %c0_23] : memref<1x2xf32, #tpu.memory_space<vmem>>, vector<1x2xf32>
    %43 = vector.broadcast %42 : vector<1x2xf32> to vector<8x2xf32>
    %44 = arith.addf %41, %43 : vector<8x2xf32>
    %c0_24 = arith.constant 0 : index
    %c0_25 = arith.constant 0 : index
    %45 = vector.load %arg10[%c0_24, %c0_25] : memref<8x2xf32, #tpu.memory_space<vmem>>, vector<8x2xf32>
    tpu.vector_store %arg10[%c0_24, %c0_25], %44 {strides = array<i32>} : memref<8x2xf32, #tpu.memory_space<vmem>>, vector<8x2xf32>,
    return
  }
  func.func @transform_0(%arg0: i32) -> (i32, i32) {
    %c0_i32 = arith.constant 0 : i32
    %c0_i32_0 = arith.constant 0 : i32
    return %arg0, %c0_i32 : i32, i32
  }
  func.func @transform_1(%arg0: i32) -> (i32, i32) {
    %c0_i32 = arith.constant 0 : i32
    %c0_i32_0 = arith.constant 0 : i32
    return %arg0, %c0_i32 : i32, i32
  }
  func.func @transform_2(%arg0: i32) -> (i32, i32) {
    %c0_i32 = arith.constant 0 : i32
    %c0_i32_0 = arith.constant 0 : i32
    %c0_i32_1 = arith.constant 0 : i32
    return %c0_i32, %c0_i32_0 : i32, i32
  }
  func.func @transform_3(%arg0: i32) -> (i32, i32) {
    %c0_i32 = arith.constant 0 : i32
    %c0_i32_0 = arith.constant 0 : i32
    %c0_i32_1 = arith.constant 0 : i32
    return %c0_i32, %c0_i32_0 : i32, i32
  }
  func.func @transform_4(%arg0: i32) -> (i32, i32) {
    %c0_i32 = arith.constant 0 : i32
    %c0_i32_0 = arith.constant 0 : i32
    %c0_i32_1 = arith.constant 0 : i32
    return %c0_i32, %c0_i32_0 : i32, i32
  }
  func.func @transform_5(%arg0: i32) -> (i32, i32) {
    %c0_i32 = arith.constant 0 : i32
    %c0_i32_0 = arith.constant 0 : i32
    %c0_i32_1 = arith.constant 0 : i32
    return %c0_i32, %c0_i32_0 : i32, i32
  }
  func.func @transform_6(%arg0: i32) -> (i32, i32) {
    %c0_i32 = arith.constant 0 : i32
    %c0_i32_0 = arith.constant 0 : i32
    %c0_i32_1 = arith.constant 0 : i32
    return %c0_i32, %c0_i32_0 : i32, i32
  }
  func.func @transform_7(%arg0: i32) -> (i32, i32) {
    %c0_i32 = arith.constant 0 : i32
    %c0_i32_0 = arith.constant 0 : i32
    %c0_i32_1 = arith.constant 0 : i32
    return %c0_i32, %c0_i32_0 : i32, i32
  }
  func.func @transform_8(%arg0: i32) -> (i32, i32) {
    %c0_i32 = arith.constant 0 : i32
    %c0_i32_0 = arith.constant 0 : i32
    %c0_i32_1 = arith.constant 0 : i32
    return %c0_i32, %c0_i32_0 : i32, i32
  }
  func.func @transform_9(%arg0: i32) -> (i32, i32) {
    %c0_i32 = arith.constant 0 : i32
    %c0_i32_0 = arith.constant 0 : i32
    return %arg0, %c0_i32 : i32, i32
  }
}

</mosaic_0001>

<bundles_post_ra>
// kernel: feedforward_nn_forward.1
= control target key start
LH: loop header
LB: loop body
LE: loop exit
PB: predicated region body
PF: predicated region fallthrough
CT: control target
= control target key end

     0   :  { %v474_v0 = vmov 0   ;;  %v475_v2 = vmov 2   ;;  %v476_v5 = vmov 0.0|0.0   ;;  %v477_v9 = vmov 1   ;;  %s582_s0 = inlined_call_operand.vmem [shape: s32[8,3], index: 0, kind: input, shape index: {}]   ;;  %s583_s2 = inlined_call_operand.vmem [shape: f32[22,32], index: 2, kind: input, shape index: {}]   ;;  %s584_s3 = inlined_call_operand.vmem [shape: f32[4,32], index: 3, kind: input, shape index: {}]   ;;  %s585_s1 = inlined_call_operand.vmem [shape: f32[8,4], index: 1, kind: input, shape index: {}]   ;;  %s586_s5 = inlined_call_operand.vmem [shape: f32[32,16], index: 5, kind: input, shape index: {}]   ;;  %s587_s4 = inlined_call_operand.vmem [shape: f32[1,32], index: 4, kind: input, shape index: {}]   ;;  %s588_s7 = inlined_call_operand.vmem [shape: f32[16,2], index: 7, kind: input, shape index: {}]   ;;  %s589_s6 = inlined_call_operand.vmem [shape: f32[1,16], index: 6, kind: input, shape index: {}]   ;;  %s590_s8 = inlined_call_operand.vmem [shape: f32[1,2], index: 8, kind: input, shape index: {}]   ;;  %s591_s9 = inlined_call_operand.vmem [shape: f32[8,2], index: 9, kind: output, shape index: {}]  }
   0x1   :  { %470 = vset.pattern.permute.xlu0 %v474_v0  ;;  %v32_v1 = vld [vmem:[%s582_s0] sm:$0xff]  ;;  %472 = vset.pattern.permute.xlu1 %v475_v2  ;;  %v53_v7 = vld [vmem:[%s583_s2 + $0x8] sm:$0xff]  ;;  %v478_v10 = vmov 0.0   ;;  %vm61_vm0 = vcmask 1043456   ;;  %vm479_vm1 = vmmov 0   ;;  %vm57_vm2 = vcmask 31744  }
   0x2   :  { %36 = vperm.xlu0 %470, %v32_v1   ;;  %v45_v3 = vadd.s32 17, %v32_v1  ;;  %v39_v4 = vadd.s32 10, %v32_v1  ;;  %452 = vmatprep.subr.bf16.mxu1 %v476_v5  ;;  %v52_v6 = vld [vmem:[%s583_s2] sm:$0xff]  ;;  %v54_v13 = vld [vmem:[%s583_s2 + $0x10] sm:$0x3f]  ;;  %vm139_vm3 = vcmask 1045504   ;;  %v33_v14 = vlaneseq }
   0x3   :  { %v453_v8 = vpack.c.bf16 %v53_v7, %v52_v6  ;;  %420 = vmatprep.subr.mxu0 %v478_v10  ;;  %v56_v11 = vld [vmem:[%s584_s3] sm:$0xf]  ;;  %422 = vmatprep.mubr.msk.f32.mxu0 %vm479_vm1, %v478_v10  ;;  %vm135_vm8 = vcmask 179200   ;;  %v223_v21 = vld [vmem:[%s586_s5 + $0x8] sm:$0xff]  ;;  %v224_v25 = vld [vmem:[%s586_s5 + $0x10] sm:$0xff]  ;;  %vm233_vm10 = vcmask 261120  }
   0x4   :  { %47 = vperm.xlu1 %472, %v45_v3   ;;  %421 = vmatpush3.msk.msra.mxu0 %vm61_vm0, %v56_v11  ;;  %v55_v12 = vld [vmem:[%s585_s1] sm:$0xff]  ;;  %v34_v16 = vand.u32 127, %v33_v14  ;;  %v225_v26 = vld [vmem:[%s586_s5 + $0x18] sm:$0xff]  ;;  %v309_v35 = vld [vmem:[%s588_s7 + $0x8] sm:$0xff]  ;;  %vm317_vm11 = vcmask 130048   ;;  %vm391_vm12 = vcmask 15360  }
   0x5   :  { %454 = vmatpush3.bf16.msra.mxu1 %v453_v8  ;;  %423 = vmatmul.mubr.msk.f32.vlgmr.msra.gmra.mrb[0].mxu0 %vm57_vm2, %v55_v12  ;;  %v222_v20 = vld [vmem:[%s586_s5] sm:$0xff]  ;;  %v459_v27 = vpack.c.bf16 %v225_v26, %v224_v25 }
   0x6   :  { %471 = vset.pattern.permute.xlu0 %v477_v9  ;;  %429 = vmatprep.subr.mxu1 %v478_v10  ;;  %v456_v22 = vpack.c.bf16 %v223_v21, %v222_v20  ;;  %v401_v29 = vld [vmem:[%s587_s4] ss:$0 sm:$0xff] }
   0x7   :  { %41 = vperm.xlu0 %471, %v39_v4   ;;  %431 = vmatprep.mubr.msk.f32.mxu1 %vm479_vm1, %v478_v10  ;;  %v308_v34 = vld [vmem:[%s588_s7] sm:$0xff] }
   0x8   :  { %455 = vmatprep.subr.bf16.mxu0 %v476_v5  ;;  %442 = vmatprep.mubr.msk.f32.mxu0 %vm479_vm1, %v478_v10  ;;  %v462_v36 = vpack.c.bf16 %v309_v35, %v308_v34  ;;  %v402_v37 = vld [vmem:[%s589_s6] ss:$0 sm:$0xff] }
   0x9   :  { %430 = vmatpush3.msk.msra.mxu1 %vm139_vm3, %v54_v13  ;;  %457 = vmatpush3.bf16.msra.mxu0 %v456_v22  ;;  %v404_v42 = vld [vmem:[%s590_s8] ss:$0 sm:$0xff] }
   0xa   :  { %461 = vmatprep.subr.bf16.mxu1 %v476_v5  ;;  %458 = vmatprep.subr.bf16.mxu0 %v476_v5 }
   0xb   :  { %473 = vset.pattern.permute.xlu0 %v475_v2 }
   0xd   :  { %460 = vmatpush3.bf16.msra.mxu0 %v459_v27 }
  0x81   :  { %v37_v15 = vpop.permute.xlu0 %36 }
  0x82   :  { %vm38_vm5 = vcmp.eq.s32.totalorder %v34_v16, %v37_v15 }
  0x83   :  { %v48_v17 = vpop.permute.xlu1 %47 }
  0x84   :  { %vm49_vm4 = vcmp.eq.s32.totalorder %v34_v16, %v48_v17 }
  0x86   :  { %v42_v18 = vpop.permute.xlu0 %41 }
  0x87   :  { %vm43_vm6 = vcmp.eq.s32.totalorder %v34_v16, %v42_v18 }
  0x88   :  { %vm44_vm7 = vmor %vm38_vm5, %vm43_vm6 }
  0x89   :  { %vm50_vm9 = vmor %vm44_vm7, %vm49_vm4 }
  0x8a   :  { %v51_v19 = vsel %vm50_vm9, 1.0, %v478_v10 }
  0x8b   :  { %432 = vmatmul.mubr.msk.f32.vlgmr.msra.gmra.mrb[0].mxu1 %vm135_vm8, %v51_v19 }
  0x8c   :  { %449 = vmatprep.mubr.msk.f32.mxu1 %vm479_vm1, %v478_v10  ;;  %463 = vmatpush3.bf16.msra.mxu1 %v462_v36 }
  0xd8   :  { %v131_v23 = vpop.f32.mrb[0].mxu0 }
  0xd9   :  { %v424_v24 = vpop.f32.mrb[1].mxu0 }
 0x15e   :  { %v209_v28 = vpop.f32.mrb[0].mxu1 }
 0x15f   :  { %v210_v30 = vadd.f32 %v209_v28, %v131_v23  ;;  %v433_v31 = vpop.f32.mrb[1].mxu1 }
 0x161   :  { %v220_v32 = vadd.f32 %v401_v29, %v210_v30 }
 0x163   :  { %v221_v33 = vmax.f32 %v220_v32, 0.0 }
 0x165   :  { %443 = vmatmul.mubr.msk.f32.vlgmr.msra.gmra.mrb[2].mxu0 %vm233_vm10, %v221_v33 }
 0x238   :  { %v303_v38 = vpop.f32.mrb[2].mxu0 }
 0x239   :  { %v304_v39 = vadd.f32 %v402_v37, %v303_v38  ;;  %v444_v40 = vpop.f32.mrb[3].mxu0 }
 0x23b   :  { %v307_v41 = vmax.f32 %v304_v39, 0.0 }
 0x23d   :  { %450 = vmatmul.mubr.msk.f32.vlgmr.msra.gmra.mrb[2].mxu1 %vm317_vm11, %v307_v41 }
 0x310   :  { %v387_v43 = vpop.f32.mrb[2].mxu1 }
 0x311   :  { %v388_v44 = vadd.f32 %v404_v42, %v387_v43  ;;  %v451_v45 = vpop.f32.mrb[3].mxu1 }
 0x313   :  { %392 = vst.msk [vmem:[%s591_s9] sm:$0xff] %vm391_vm12, %v388_v44 }

</bundles_post_ra>
